<compile_context>
chip_gen: v6e
topology: v6e:2x2x1
jax: 0.10.0
libtpu: 0.0.40
codegen_flags: <defaults>
</compile_context>

<pallas_src>
import functools

import jax
import jax.numpy as jnp
from jax import lax
from jax.experimental import pallas as pl
from jax.experimental.pallas import tpu as pltpu


# ----------------------------- Pallas kernels ------------------------------

def _mm_kernel(a_ref, w_ref, shift_ref, o_ref, *, relu):
    # Single-K-tile specialization: no accumulator scratch, direct write.
    y = jnp.dot(a_ref[...], w_ref[...], preferred_element_type=jnp.float32)
    y = y + shift_ref[...]
    if relu:
        y = jnp.maximum(y, 0.0)
    o_ref[...] = y.astype(o_ref.dtype)


def _mm_skip_kernel(a_ref, w_ref, shift_ref, skip_ref, o_ref, *, relu):
    y = jnp.dot(a_ref[...], w_ref[...], preferred_element_type=jnp.float32)
    y = y + shift_ref[...] + skip_ref[...].astype(jnp.float32)
    if relu:
        y = jnp.maximum(y, 0.0)
    o_ref[...] = y.astype(o_ref.dtype)


def _mm_kernel_ktiled(a_ref, w_ref, shift_ref, o_ref, acc_ref, *, relu):
    # K-tiled path: accumulator initialized with the broadcast BN shift (init store
    # happens anyway -> the finalize add is free).
    kk = pl.program_id(1)

    @pl.when(kk == 0)
    def _():
        acc_ref[...] = jnp.broadcast_to(shift_ref[...], acc_ref.shape).astype(jnp.float32)

    acc_ref[...] += jnp.dot(a_ref[...], w_ref[...], preferred_element_type=jnp.float32)

    @pl.when(kk == pl.num_programs(1) - 1)
    def _():
        y = acc_ref[...]
        if relu:
            y = jnp.maximum(y, 0.0)
        o_ref[...] = y.astype(o_ref.dtype)


def _mm_skip_kernel_ktiled(a_ref, w_ref, shift_ref, skip_ref, o_ref, acc_ref, *, relu):
    kk = pl.program_id(1)

    @pl.when(kk == 0)
    def _():
        acc_ref[...] = jnp.broadcast_to(shift_ref[...], acc_ref.shape).astype(jnp.float32)

    acc_ref[...] += jnp.dot(a_ref[...], w_ref[...], preferred_element_type=jnp.float32)

    @pl.when(kk == pl.num_programs(1) - 1)
    def _():
        y = acc_ref[...] + skip_ref[...].astype(jnp.float32)
        if relu:
            y = jnp.maximum(y, 0.0)
        o_ref[...] = y.astype(o_ref.dtype)


# ----------------------------- tiling helpers -------------------------------

def _round_up(x, n):
    return ((x + n - 1) // n) * n


def _pad_cols(x, width):
    """Zero-pad the last dim to `width` (lane-dense channel padding)."""
    pad = width - x.shape[-1]
    if pad:
        x = jnp.pad(x, [(0, 0)] * (x.ndim - 1) + [(0, pad)])
    return x


def _vmem_budget():
    """(per-step VMEM budget, compiler scoped-VMEM limit), derived from the chip.

    v5e/v6e report ~128 MiB, v7x ~64 MiB per core.  ~60% / 75% of capacity leaves
    double-buffering + compiler scratch headroom on every generation.
    """
    try:
        cap = pltpu.get_tpu_info().vmem_capacity_bytes
    except Exception:
        cap = 64 * 1024 * 1024  # conservative fallback (v7x-sized)
    budget = min(int(cap * 0.60), 96 * 1024 * 1024)
    limit = min(int(cap * 0.75), 100 * 1024 * 1024)
    return budget, limit


def _choose_m_tile(m, tk, c_pad, in_isz, out_isz, has_skip, multi_k, budget,
                   max_tm=4096):
    """Largest M tile that divides M and fits the per-step VMEM budget.

    Prefers an even number of M blocks so the "parallel" M axis load-balances across
    v7x's two TensorCores (the extra grid steps are negligible on 1-TC chips)."""

    def step_bytes(tm):
        b = 2 * tm * tk * in_isz        # A block, double-buffered
        b += 2 * tk * c_pad * in_isz    # W block
        b += 2 * tm * c_pad * out_isz   # output block
        if multi_k:
            b += tm * c_pad * 4         # f32 accumulator scratch
        b += 2 * c_pad * 4              # shift
        if has_skip:
            b += 2 * tm * c_pad * in_isz
        return b

    # Sublane granularity: 8 for f32 blocks, 16 when any operand/output is 16-bit.
    gran = max(8, 32 // min(in_isz, out_isz))
    divisors = [t for t in range(gran, min(m, max_tm) + 1, gran)
                if m % t == 0 and step_bytes(t) <= budget]
    if divisors:
        even = [t for t in divisors if (m // t) % 2 == 0]
        return max(even) if even else max(divisors)
    # Ragged fallback: Pallas masks the partial last block (no HBM padding needed).
    best = min(max_tm, _round_up(m, gran))
    while best > gran and step_bytes(best) > budget:
        best -= gran
    return best


# ------------------------------ Pallas wrapper ------------------------------

def fused_matmul(a, w, shift, skip=None, *, relu=True,
                 out_dtype=jnp.float32, compute_dtype=jnp.float32):
    """(M,K) @ (K,C_pad) matmul with fused shift (+skip) (+ReLU).

    `w` already carries the folded BN scale and is zero-padded to C_pad (multiple of
    128 lanes).  Accumulation is always f32 (in registers when K fits one tile, in
    VMEM scratch over a K grid axis otherwise).
    """
    m, k = a.shape
    c_pad = w.shape[1]
    assert c_pad % 128 == 0, c_pad
    assert w.shape[0] == k, (w.shape, k)
    assert shift.shape[-1] == c_pad, (shift.shape, c_pad)

    vmem_budget, vmem_limit = _vmem_budget()
    in_isz = jnp.dtype(compute_dtype).itemsize
    out_isz = jnp.dtype(out_dtype).itemsize

    # K handling: keep K whole when it fits in a single tile (a full-extent block is
    # legal even when K is not a 128-multiple, and avoids zero-pad HBM inflation of A);
    # otherwise zero-pad K to a multiple of the K tile so K tiles cleanly and the
    # per-step W block stays bounded (fixes the old "keep K whole" VMEM blowup).
    max_tk = 512
    if k <= max_tk:
        tk = k
        k_pad = k
    else:
        tk = max_tk
        k_pad = _round_up(k, tk)
        if k_pad != k:
            a = jnp.pad(a, ((0, 0), (0, k_pad - k)))
            w = jnp.pad(w, ((0, k_pad - k), (0, 0)))
    k_tiles = k_pad // tk
    multi_k = k_tiles > 1

    tm = _choose_m_tile(m, tk, c_pad, in_isz, out_isz, skip is not None, multi_k,
                        vmem_budget)
    m_tiles = pl.cdiv(m, tm)

    a = a.astype(compute_dtype)
    w = w.astype(compute_dtype)
    shift = shift.reshape(1, c_pad).astype(jnp.float32)

    if multi_k:
        grid = (m_tiles, k_tiles)
        a_spec = pl.BlockSpec((tm, tk), lambda i, kk: (i, kk))
        w_spec = pl.BlockSpec((tk, c_pad), lambda i, kk: (kk, 0))
        s_spec = pl.BlockSpec((1, c_pad), lambda i, kk: (0, 0))
        x_spec = pl.BlockSpec((tm, c_pad), lambda i, kk: (i, 0))
        o_spec = pl.BlockSpec((tm, c_pad), lambda i, kk: (i, 0))
        scratch = [pltpu.VMEM((tm, c_pad), jnp.float32)]
        semantics = ("parallel", "arbitrary")
        kernel = functools.partial(
            _mm_skip_kernel_ktiled if skip is not None else _mm_kernel_ktiled,
            relu=relu)
    else:
        grid = (m_tiles,)
        a_spec = pl.BlockSpec((tm, tk), lambda i: (i, 0))
        w_spec = pl.BlockSpec((tk, c_pad), lambda i: (0, 0))
        s_spec = pl.BlockSpec((1, c_pad), lambda i: (0, 0))
        x_spec = pl.BlockSpec((tm, c_pad), lambda i: (i, 0))
        o_spec = pl.BlockSpec((tm, c_pad), lambda i: (i, 0))
        scratch = []
        semantics = ("parallel",)
        kernel = functools.partial(
            _mm_skip_kernel if skip is not None else _mm_kernel, relu=relu)

    inputs = [a, w, shift]
    in_specs = [a_spec, w_spec, s_spec]
    if skip is not None:
        inputs.append(skip.astype(compute_dtype))
        in_specs.append(x_spec)

    return pl.pallas_call(
        kernel,
        out_shape=jax.ShapeDtypeStruct((m, c_pad), out_dtype),
        grid=grid,
        in_specs=in_specs,
        out_specs=o_spec,
        scratch_shapes=scratch,
        compiler_params=pltpu.CompilerParams(
            # M is megacore-shardable (even block counts preferred); K (when present)
            # carries the resident accumulator so it must be "arbitrary".
            dimension_semantics=semantics,
            vmem_limit_bytes=vmem_limit,
        ),
    )(*inputs)


# ------------------------------- JAX glue -----------------------------------

def im2col(x_nhwc, kh, kw, stride, pad):
    """Extract conv patches. Returns (N*Ho*Wo, kh*kw*C) and output spatial dims."""
    n, h, w, c = x_nhwc.shape
    xp = jnp.pad(x_nhwc, ((0, 0), (pad, pad), (pad, pad), (0, 0)))
    ho = (h + 2 * pad - kh) // stride + 1
    wo = (w + 2 * pad - kw) // stride + 1
    cols = []
    for i in range(kh):
        for j in range(kw):
            cols.append(xp[:, i:i + stride * ho:stride, j:j + stride * wo:stride, :])
    cols = jnp.stack(cols, axis=3)  # (n, ho, wo, kh*kw, c)
    return cols.reshape(n * ho * wo, kh * kw * c), ho, wo


def _fold_bn(gamma, beta, mean, var, conv_bias, eps=1e-5):
    # Inference-mode BN folded with the preceding conv bias into (scale, shift).
    scale = gamma / jnp.sqrt(var + eps)
    shift = beta + scale * (conv_bias - mean)
    return scale, shift


def residual_forward(x_nchw, params, skip_connection, strides, *,
                     compute_dtype=jnp.float32, eps=1e-5):
    """Pallas implementation of Residual.forward (input/output are NCHW, float32).

    compute_dtype: dtype fed to the MXU (A / W / skip / intermediate activation).
    Accumulation, BN shift, skip-add and ReLU always run in float32 in-kernel.
    """
    x_nhwc = jnp.transpose(x_nchw, (0, 2, 3, 1)).astype(jnp.float32)
    n, h, w, c_in = x_nhwc.shape
    c_out = params["w1"].shape[0]
    c_pad = _round_up(c_out, 128)  # lane-dense output channels for the Pallas matmul

    if not skip_connection:
        assert strides == 1 and c_in == c_out, (
            "identity skip requires strides == 1 and C_in == C_out; got "
            f"strides={strides}, C_in={c_in}, C_out={c_out}")

    # conv1 (3x3, stride, pad 1) + BN1 (scale folded into W) + ReLU
    a1, ho, wo = im2col(x_nhwc, 3, 3, strides, 1)
    s1, t1 = _fold_bn(params["gamma1"], params["beta1"], params["mean1"],
                      params["var1"], params["b1"], eps)
    w1 = params["w1"].transpose(2, 3, 1, 0).reshape(9 * c_in, c_out) * s1[None, :]
    y1 = fused_matmul(a1, _pad_cols(w1, c_pad), _pad_cols(t1, c_pad),
                      relu=True, out_dtype=compute_dtype, compute_dtype=compute_dtype)
    # Drop the padded lanes before the second im2col so conv2's K stays 9*C_out.
    y1_nhwc = y1[:, :c_out].reshape(n, ho, wo, c_out)

    # skip branch (produced directly at the padded channel width -> no re-pad)
    if skip_connection:
        xs = x_nhwc[:, ::strides, ::strides, :].reshape(n * ho * wo, c_in)
        ws = params["ws"].transpose(2, 3, 1, 0).reshape(c_in, c_out)
        skip = fused_matmul(xs, _pad_cols(ws, c_pad), _pad_cols(params["bs"], c_pad),
                            relu=False, out_dtype=compute_dtype,
                            compute_dtype=compute_dtype)
    else:
        # identity skip (strides == 1, c_in == c_out asserted above)
        skip = _pad_cols(x_nhwc.reshape(n * h * w, c_in), c_pad)

    # conv2 (3x3, stride 1, pad 1) + BN2 (folded) + skip-add + ReLU
    a2, _, _ = im2col(y1_nhwc, 3, 3, 1, 1)
    s2, t2 = _fold_bn(params["gamma2"], params["beta2"], params["mean2"],
                      params["var2"], params["b2"], eps)
    w2 = params["w2"].transpose(2, 3, 1, 0).reshape(9 * c_out, c_out) * s2[None, :]
    y = fused_matmul(a2, _pad_cols(w2, c_pad), _pad_cols(t2, c_pad), skip=skip,
                     relu=True, out_dtype=jnp.float32, compute_dtype=compute_dtype)
    y = y[:, :c_out].reshape(n, ho, wo, c_out)
    return jnp.transpose(y, (0, 3, 1, 2))


# ------------------------- deterministic parameters --------------------------

def init_residual_params(key, c_in, c_out, skip_connection):
    ks = jax.random.split(key, 16)

    def conv_w(k, co, ci, kh, kw):
        fan_in = ci * kh * kw
        return jax.random.normal(k, (co, ci, kh, kw), jnp.float32) / jnp.sqrt(fan_in)

    p = {
        "w1": conv_w(ks[0], c_out, c_in, 3, 3),
        "b1": 0.1 * jax.random.normal(ks[1], (c_out,), jnp.float32),
        "gamma1": 1.0 + 0.1 * jax.random.normal(ks[2], (c_out,), jnp.float32),
        "beta1": 0.1 * jax.random.normal(ks[3], (c_out,), jnp.float32),
        "mean1": 0.1 * jax.random.normal(ks[4], (c_out,), jnp.float32),
        "var1": 1.0 + 0.1 * jnp.abs(jax.random.normal(ks[5], (c_out,), jnp.float32)),
        "w2": conv_w(ks[6], c_out, c_out, 3, 3),
        "b2": 0.1 * jax.random.normal(ks[7], (c_out,), jnp.float32),
        "gamma2": 1.0 + 0.1 * jax.random.normal(ks[8], (c_out,), jnp.float32),
        "beta2": 0.1 * jax.random.normal(ks[9], (c_out,), jnp.float32),
        "mean2": 0.1 * jax.random.normal(ks[10], (c_out,), jnp.float32),
        "var2": 1.0 + 0.1 * jnp.abs(jax.random.normal(ks[11], (c_out,), jnp.float32)),
    }
    if skip_connection:
        p["ws"] = conv_w(ks[12], c_out, c_in, 1, 1)
        p["bs"] = 0.1 * jax.random.normal(ks[13], (c_out,), jnp.float32)
    return p


# ------------------------------ pure-JAX reference ---------------------------

def reference_forward(x, params, skip_connection, strides, eps=1e-5):
    dn = ("NCHW", "OIHW", "NCHW")

    def conv(x, w, b, stride, pad):
        y = lax.conv_general_dilated(x, w, (stride, stride),
                                     ((pad, pad), (pad, pad)), dimension_numbers=dn)
        return y + b.reshape(1, -1, 1, 1)

    def bn(x, g, bta, m, v):
        g, bta, m, v = (t.reshape(1, -1, 1, 1) for t in (g, bta, m, v))
        return (x - m) / jnp.sqrt(v + eps) * g + bta

    y = conv(x, params["w1"], params["b1"], strides, 1)
    y = jax.nn.relu(bn(y, params["gamma1"], params["beta1"], params["mean1"], params["var1"]))
    y = conv(y, params["w2"], params["b2"], 1, 1)
    y = bn(y, params["gamma2"], params["beta2"], params["mean2"], params["var2"])
    xs = conv(x, params["ws"], params["bs"], strides, 0) if skip_connection else x
    return jax.nn.relu(y + xs)


# ----------------------------------- main ------------------------------------

if __name__ == "__main__":
    key = jax.random.PRNGKey(0)
    kx1, kx2, kp1, kp2 = jax.random.split(key, 4)

    # Config A: skip_connection=True, strides=2, C_in=4 -> C_out=8, 16x16 spatial.
    x1 = jax.random.normal(kx1, (2, 4, 16, 16), jnp.float32)
    params1 = init_residual_params(kp1, 4, 8, skip_connection=True)
    out1 = jax.block_until_ready(residual_forward(x1, params1, True, 2))
    ref1 = reference_forward(x1, params1, True, 2)
    assert out1.shape == (2, 8, 8, 8), out1.shape
    assert jnp.allclose(out1, ref1, atol=1e-4, rtol=1e-4), float(jnp.max(jnp.abs(out1 - ref1)))

    # Config B: skip_connection=False, strides=1, C_in == C_out = 8 (identity skip).
    x2 = jax.random.normal(kx2, (2, 8, 16, 16), jnp.float32)
    params2 = init_residual_params(kp2, 8, 8, skip_connection=False)
    out2 = jax.block_until_ready(residual_forward(x2, params2, False, 1))
    ref2 = reference_forward(x2, params2, False, 1)
    assert out2.shape == (2, 8, 16, 16), out2.shape
    assert jnp.allclose(out2, ref2, atol=1e-4, rtol=1e-4), float(jnp.max(jnp.abs(out2 - ref2)))

    # bf16 MXU-input path (accuracy-gated): f32 accumulation/affine in-kernel, bf16
    # A/W/skip and intermediate activation -> ~2x MXU throughput and ~2x less HBM traffic.
    out1_bf16 = jax.block_until_ready(
        residual_forward(x1, params1, True, 2, compute_dtype=jnp.bfloat16))
    bf16_err = float(jnp.max(jnp.abs(out1_bf16 - ref1)))
    assert bf16_err < 0.25, bf16_err

    print("KERNEL_OK")
</pallas_src>

<mosaic_0001>
module attributes {stable_mosaic.version = 11 : i64} {
  func.func @_mm_kernel(%arg0: i32, %arg1: memref<64x36xf32, #tpu.memory_space<vmem>>, %arg2: memref<36x128xf32, #tpu.memory_space<vmem>>, %arg3: memref<1x128xf32, #tpu.memory_space<vmem>>, %arg4: memref<64x128xf32, #tpu.memory_space<vmem>>) attributes {dimension_semantics = [#tpu.dimension_semantics<parallel>], iteration_bounds = array<i64: 2>, scalar_prefetch = 0 : i64, scratch_operands = 0 : i64, tpu.core_type = #tpu.core_type<tc>, window_params = [{transform_indices = @transform_0, window_bounds = array<i64: 64, 36>}, {pipeline_mode = #tpu.pipeline_mode<synchronous>, transform_indices = @transform_1, window_bounds = array<i64: 36, 128>}, {pipeline_mode = #tpu.pipeline_mode<synchronous>, transform_indices = @transform_2, window_bounds = array<i64: 1, 128>}, {transform_indices = @transform_3, window_bounds = array<i64: 64, 128>}]} {
    %c0 = arith.constant 0 : index
    %c0_0 = arith.constant 0 : index
    %0 = vector.load %arg1[%c0, %c0_0] : memref<64x36xf32, #tpu.memory_space<vmem>>, vector<64x36xf32>
    %c0_1 = arith.constant 0 : index
    %c0_2 = arith.constant 0 : index
    %1 = vector.load %arg2[%c0_1, %c0_2] : memref<36x128xf32, #tpu.memory_space<vmem>>, vector<36x128xf32>
    %cst = arith.constant dense<0.000000e+00> : vector<64x128xf32>
    %2 = tpu.matmul %0, %1, %cst {dimension_numbers = #tpu.dot_dimension_numbers<[1], [0], [0], [1], [0, 0, 1, 1], [], []>} : vector<64x36xf32>, vector<36x128xf32>, vector<64x128xf32> -> vector<64x128xf32>
    %c0_3 = arith.constant 0 : index
    %c0_4 = arith.constant 0 : index
    %3 = vector.load %arg3[%c0_3, %c0_4] : memref<1x128xf32, #tpu.memory_space<vmem>>, vector<1x128xf32>
    %4 = vector.broadcast %3 : vector<1x128xf32> to vector<64x128xf32>
    %5 = arith.addf %2, %4 : vector<64x128xf32>
    %cst_5 = arith.constant 0.000000e+00 : f32
    %6 = vector.broadcast %cst_5 : f32 to vector<64x128xf32>
    %7 = arith.maximumf %5, %6 : vector<64x128xf32>
    %c0_6 = arith.constant 0 : index
    %c0_7 = arith.constant 0 : index
    %8 = vector.load %arg4[%c0_6, %c0_7] : memref<64x128xf32, #tpu.memory_space<vmem>>, vector<64x128xf32>
    tpu.vector_store %arg4[%c0_6, %c0_7], %7 {strides = array<i32>} : memref<64x128xf32, #tpu.memory_space<vmem>>, vector<64x128xf32>,
    return
  }
  func.func @transform_0(%arg0: i32) -> (i32, i32) {
    %c0_i32 = arith.constant 0 : i32
    %c0_i32_0 = arith.constant 0 : i32
    return %arg0, %c0_i32 : i32, i32
  }
  func.func @transform_1(%arg0: i32) -> (i32, i32) {
    %c0_i32 = arith.constant 0 : i32
    %c0_i32_0 = arith.constant 0 : i32
    %c0_i32_1 = arith.constant 0 : i32
    return %c0_i32, %c0_i32_0 : i32, i32
  }
  func.func @transform_2(%arg0: i32) -> (i32, i32) {
    %c0_i32 = arith.constant 0 : i32
    %c0_i32_0 = arith.constant 0 : i32
    %c0_i32_1 = arith.constant 0 : i32
    return %c0_i32, %c0_i32_0 : i32, i32
  }
  func.func @transform_3(%arg0: i32) -> (i32, i32) {
    %c0_i32 = arith.constant 0 : i32
    %c0_i32_0 = arith.constant 0 : i32
    return %arg0, %c0_i32 : i32, i32
  }
}

</mosaic_0001>

<bundles_post_ra>
// kernel: tpu_custom_call.1
= control target key start
LH: loop header
LB: loop body
LE: loop exit
PB: predicated region body
PF: predicated region fallthrough
CT: control target
= control target key end

     0   :  { %8 = vsyncpa [#allocation3], 0  ;;  %s743_s0 = inlined_call_operand.vmem [shape: f32[128,36], index: 0, kind: input, shape index: {}]   ;;  %s744_s1 = inlined_call_operand.vmem [shape: f32[36,128], index: 1, kind: input, shape index: {}]   ;;  %s745_s2 = inlined_call_operand.vmem [shape: f32[1,128], index: 2, kind: input, shape index: {}]   ;;  %s746_s3 = inlined_call_operand.hbm [shape: f32[128,128], index: 3, kind: output, shape index: {}]  }
   0x1   :  { %10 = vsyncpa [#allocation3 + $0x1], 0  ;;  %s612_s12 = smov 0   ;;  %s614_s13 = smov 0  }
   0x2   :  { %s616_s14 = smov 0   ;;  %s618_s15 = smov 0  }
   0x3 LB: > { %s633_s16 = sadd.s32 4294967295, %s587_s15   ;;  %s418_s17 = sadd.s32 4294967294, %s587_s15   ;;  %s587_s15 = sphi %s618_s15, %s752_s15   ;;  %s583_s14 = sphi %s616_s14, %s751_s14   ;;  %s579_s13 = sphi %s614_s13, %s750_s13   ;;  %s575_s12 = sphi %s612_s12, %s749_s12  }
   0x4   : > { %s637_s18 = sadd.s32 1, %s587_s15   ;;  %s91_s19 = sadd.s32 1, %s583_s14 }
   0x5   : > { %s88_s20 = ssub.s32 %s587_s15, %s637_s18  ;;  %p101_p0 = scmp.ne.s32.totalorder %s583_s14, %s579_s13 }
   0x6   : > { %p89_p1 = scmp.eq.s32.totalorder %s88_s20, 0  ;;  %p102_p2 = scmp.eq.s32.totalorder %s633_s16, 1 }
   0x7   : > { %p107_p3 = scmp.ne.s32.totalorder %s579_s13, %s575_s12  ;;  %p108_p4 = scmp.eq.s32.totalorder %s418_s17, 1 }
   0x8   : > { %s648_s21 = scalar_select %p89_p1, %s583_s14, %s91_s19  }
   0x9   : > { %p650_p5 = por %p102_p2, %p101_p0  ;;  %p654_p6 = por %p108_p4, %p107_p3 }
   0xa   : > { %p421_p7 = scmp.ge.s32.totalorder %s587_s15, 1  ;;  %p141_p8 = scmp.lt.s32.totalorder %s587_s15, 3 }
   0xc   : > { %p142_p9 = pnand %p421_p7, %p141_p8 }
   0xd   : > { %s423_s28 = sshll.u32 (!%p142_p9), %s633_s16, 3  ;;  %s162_s17 = sand.u32 (!%p142_p9), 1, %s579_s13  }
   0xe   : > { %145 = sbr.rel (%p142_p9) target bundleno = 248 (0xf8), region = 32  ;;  %p166_p10 = scmp.lt.s32.totalorder (!%p142_p9), %s423_s28, 15 }
   0xf   : > { %s422_s24 = sshll.u32 (!%p142_p9), %s162_s17, 6  ;;  %s440_s26 = sshll.u32 (!%p142_p9), %s633_s16, 10 }
  0x10   : > { %s164_s25 = scalar_lea.vmem (!%p142_p9), [#allocation2], %s422_s24  ;;  %s697_s30 = scalar_lea.hbm (!%p142_p9), %s746_s3, %s440_s26 }
  0x11   : > { %s356_s27 = sshll.u32 (!%p142_p9), %s164_s25, 4  ;;  %s703_s16 = scalar_lea.sflag (!%p142_p9), [#allocation3], %s162_s17  ;;  %s699_s27 = int_to_ptr.vmem [resolvable:$true] %s356_s27 }
  0x12   : > { %s527_s4 = scalar_lea.vmem (!%p142_p9), %s699_s27, 1024  ;;  %s589_s5 = smov (!%p142_p9), [#allocation2]  }
  0x13   : > { %v184_v0 = vld [vmem:[%s744_s1 + $0x20] sm:$0xf]  ;;  %vm217_vm0 = vcmask 1043456   ;;  %v183_v1 = vld [vmem:[%s744_s1 + $0x18] sm:$0xff]  ;;  %v182_v2 = vld [vmem:[%s744_s1 + $0x10] sm:$0xff]  ;;  %s754_s28 = smov (!%p166_p10, %s423_s28), 15  ;;  %p528_p11 = scmp.ne.s32.totalorder %s699_s27, %s527_s4 }
  0x14   : > { %454 = vmatprep.subr.msk.mxu0 %vm217_vm0, %v184_v0  ;;  %476 = vmatprep.subr.msk.mxu1 %vm217_vm0, %v184_v0  ;;  %v181_v3 = vld [vmem:[%s744_s1 + $0x8] sm:$0xff]  ;;  %s424_s6 = sshll.u32 %s754_s28, 3  ;;  %v180_v4 = vld [vmem:[%s744_s1] sm:$0xff]  ;;  %vm192_vm1 = vcmask 293888  }
  0x15   : > { %455 = vmatpush3.msk.msra.mxu0 %vm217_vm0, %v184_v0  ;;  %481 = vmatpush3.msk.msra.mxu1 %vm217_vm0, %v184_v0  ;;  %s169_s11 = scalar_lea.vmem %s743_s0, %s424_s6  ;;  %v425_v13 = vld [vmem:[%s745_s2] ss:$0 sm:$0xff]  ;;  %p529_p12 = pnand %p528_p11, %p650_p5 }
  0x16   : > { %456 = vmatprep.subr.mxu0 %v183_v1  ;;  %477 = vmatprep.subr.mxu1 %v183_v1  ;;  %v172_v5 = vld [vmem:[%s169_s11] sm:$0xff]  ;;  %v173_v7 = vld [vmem:[%s169_s11 + $0x8] sm:$0xff]  ;;  %v174_v9 = vld [vmem:[%s169_s11 + $0x10] sm:$0xff]  ;;  %s531_s6 = sshll.u32 %s589_s5, 4  ;;  %s532_s6 = int_to_ptr.vmem [resolvable:$false] %s531_s6 }
  0x17   : > { %457 = vmatpush3.msra.mxu0 %v183_v1  ;;  %482 = vmatpush3.msra.mxu1 %v183_v1  ;;  %v176_v6 = vld [vmem:[%s169_s11 + $0x20] sm:$0xff]  ;;  %v177_v8 = vld [vmem:[%s169_s11 + $0x28] sm:$0xff]  ;;  %v178_v10 = vld [vmem:[%s169_s11 + $0x30] sm:$0xff]  ;;  %p530_p13 = pneg %p529_p12  ;;  %s533_s7 = scalar_lea.vmem %s532_s6, 2048 }
  0x18   : > { %458 = vmatprep.subr.mxu0 %v182_v2  ;;  %478 = vmatprep.subr.mxu1 %v182_v2  ;;  %v175_v11 = vld [vmem:[%s169_s11 + $0x18] sm:$0xff]  ;;  %p534_p0 = scmp.lt.s32.totalorder %s699_s27, %s532_s6  ;;  %p535_p1 = scmp.lt.s32.totalorder %s533_s7, %s527_s4 }
  0x19   : > { %459 = vmatpush3.msra.mxu0 %v182_v2  ;;  %483 = vmatpush3.msra.mxu1 %v182_v2  ;;  %v179_v12 = vld [vmem:[%s169_s11 + $0x38] sm:$0xff] }
  0x1a   : > { %460 = vmatprep.subr.mxu0 %v181_v3  ;;  %479 = vmatprep.subr.mxu1 %v181_v3  ;;  %p536_p2 = por %p535_p1, %p534_p0 }
  0x1b   : > { %461 = vmatpush3.msra.mxu0 %v181_v3  ;;  %484 = vmatpush3.msra.mxu1 %v181_v3 }
  0x1c   : > { %462 = vmatprep.subr.mxu0 %v180_v4  ;;  %480 = vmatprep.subr.mxu1 %v180_v4  ;;  %p537_p3 = pnand %p536_p2, %p530_p13 }
  0x1d   : > { %463 = vmatpush3.msra.mxu0 %v180_v4  ;;  %485 = vmatpush3.msra.mxu1 %v180_v4 }
  0x1e   : > { %464 = vmatprep.mubr.msk.f32.mxu0 %vm192_vm1, %v172_v5  ;;  %470 = vmatprep.mubr.msk.f32.mxu1 %vm192_vm1, %v176_v6 }
  0x1f   : > { %465 = vmatmul.mubr.msk.f32.vlgmr.msra.gmra.mxu0 %vm192_vm1, %v173_v7  ;;  %471 = vmatmul.mubr.msk.f32.vlgmr.msra.gmra.mxu1 %vm192_vm1, %v177_v8 }
  0x20   : > { %467 = vmatprep.mubr.msk.f32.mxu0 %vm192_vm1, %v174_v9  ;;  %473 = vmatprep.mubr.msk.f32.mxu1 %vm192_vm1, %v178_v10 }
  0x23   : > { %468 = vmatmul.mubr.msk.f32.gmra.mxu0 %vm192_vm1, %v175_v11  ;;  %474 = vmatmul.mubr.msk.f32.gmra.mxu1 %vm192_vm1, %v179_v12 }
  0xdf   : > { %v466_v14 = vpop.f32.mrf.mxu0  ;;  %v472_v15 = vpop.f32.mrf.mxu1 }
  0xe0   : > { %v293_v16 = vadd.f32 %v466_v14, %v425_v13  ;;  %v313_v17 = vadd.f32 %v472_v15, %v425_v13 }
  0xe1   : > { %v287_v18 = vpop.f32.mrf.mxu0  ;;  %v307_v19 = vpop.f32.mrf.mxu1 }
  0xe2   : > { %v327_v20 = vmax.f32 %v293_v16, 0.0  ;;  %v331_v21 = vmax.f32 %v313_v17, 0.0  ;;  %v288_v22 = vadd.f32 %v425_v13, %v287_v18  ;;  %v308_v23 = vadd.f32 %v425_v13, %v307_v19 }
  0xe3   : > { %v469_v24 = vpop.f32.mrf.mxu0  ;;  %v475_v25 = vpop.f32.mrf.mxu1 }
  0xe4   : > { %335 = vst [vmem:[%s164_s25 + $0x8] sm:$0xff] %v327_v20  ;;  %339 = vst [vmem:[%s164_s25 + $0x28] sm:$0xff] %v331_v21  ;;  %v326_v26 = vmax.f32 %v288_v22, 0.0  ;;  %v330_v27 = vmax.f32 %v308_v23, 0.0  ;;  %v303_v28 = vadd.f32 %v469_v24, %v425_v13  ;;  %v323_v29 = vadd.f32 %v475_v25, %v425_v13 }
  0xe5   : > { %v297_v30 = vpop.f32.mrf.mxu0  ;;  %v317_v31 = vpop.f32.mrf.mxu1 }
  0xe6   : > { %334 = vst [vmem:[%s164_s25] sm:$0xff] %v326_v26  ;;  %338 = vst [vmem:[%s164_s25 + $0x20] sm:$0xff] %v330_v27  ;;  %v329_v32 = vmax.f32 %v303_v28, 0.0  ;;  %v333_v33 = vmax.f32 %v323_v29, 0.0  ;;  %v298_v34 = vadd.f32 %v425_v13, %v297_v30  ;;  %v318_v35 = vadd.f32 %v425_v13, %v317_v31 }
  0xe8   : > { %337 = vst [vmem:[%s164_s25 + $0x18] sm:$0xff] %v329_v32  ;;  %341 = vst [vmem:[%s164_s25 + $0x38] sm:$0xff] %v333_v33  ;;  %v328_v36 = vmax.f32 %v298_v34, 0.0  ;;  %v332_v37 = vmax.f32 %v318_v35, 0.0 }
  0xea   : > { %336 = vst [vmem:[%s164_s25 + $0x10] sm:$0xff] %v328_v36  ;;  %340 = vst [vmem:[%s164_s25 + $0x30] sm:$0xff] %v332_v37 }
  0xeb   : > { %540 = shalt.err (!%p537_p3)
}
  0xec   : > { %s541_s8 = scalar_lea.hbm %s697_s30, 1024  ;;  %s545_s11 = scalar_lea.hbm %s746_s3, 2048 }
  0xed   : > { %p542_p4 = scmp.ne.s32.totalorder %s697_s30, %s541_s8  ;;  %p546_p9 = scmp.lt.s32.totalorder %s697_s30, %s746_s3 }
  0xee   : > { %p547_p10 = scmp.lt.s32.totalorder %s545_s11, %s541_s8 }
  0xef   : > { %p543_p7 = pnand %p542_p4, %p650_p5 }
  0xf0   : > { %p548_p11 = por %p547_p10, %p546_p9 }
  0xf1   : > { %p544_p8 = pneg %p543_p7 }
  0xf3   : > { %p549_p12 = pnand %p548_p11, %p544_p8 }
  0xf5   : > { %552 = shalt.err (!%p549_p12)
}
  0xf6   : > { %s590_s20 = smov 128   ;;  %s591_s24 = smov 8  }
  0xf7   : > { %486 = dma.vmem_to_hbm [thread:$0]  (%p650_p5), %s699_s27, 1024, %s697_s30, %s703_s16, %s590_s20, %s590_s20, %s591_s24  }
  0xf8 PF: > { %p492_p13 = scmp.ge.s32.totalorder %s587_s15, 2  ;;  %s371_s25 = sand.u32 1, %s575_s12  }
  0xf9   : > { %s372_s26 = scalar_lea.sflag [#allocation3], %s371_s25 }
  0xfa   : > { %p489_p0 = pnand %p492_p13, %p654_p6 }
  0xfc   : > { %p490_p1 = pneg %p489_p0 }
  0xfe   : > { %570 = dma.done.wait (%p490_p1), %s372_s26, 1024  }
  0xff   : > { %572 = vsyncadd (%p490_p1), %s372_s26, 4294966272  ;;  %p13_p2 = scmp.ge.s32.totalorder %s637_s18, 4   ;;  %s749_s12 = smov %s579_s13 }
 0x100   : > { %s750_s13 = smov %s583_s14  ;;  %s751_s14 = smov %s648_s21 }
 0x101   : > { %s752_s15 = smov %s637_s18  ;;  %15 = sbr.rel (!%p13_p2) target bundleno = 3 (0x3), region = 67 }
 0x106   :  { %377 = vsyncpa [#allocation3], 1 }
 0x107   :  { %379 = vsyncpa [#allocation3 + $0x1], 1 }

</bundles_post_ra>
